<compile_context>
chip_gen: v6e
topology: v6e:2x2x1
jax: 0.10.0
libtpu: 0.0.40
codegen_flags: <defaults>
</compile_context>

<pallas_src>
import functools
import math
from typing import NamedTuple, Tuple

import jax
import jax.numpy as jnp
from jax.experimental import pallas as pl
from jax.experimental.pallas import tpu as pltpu

_LANE = 128      # lane width: pad every feature dim to a multiple of this
_SUBLANE = 16    # bf16 sublane packing: keep row tiles multiples of 16
_MiB = 1024 * 1024


def _round_up(x, m):
    return (x + m - 1) // m * m


def _vmem_capacity_bytes():
    try:
        return int(pltpu.get_tpu_info().vmem_capacity_bytes)
    except Exception:
        return 64 * _MiB   # conservative (v7x-sized); safe everywhere


def _default_act_dtype(compute_dtype):
    """bf16 inter-layer activations on chips with a bf16 VPU (v6e/v7x);
    f32 on v5e and older where bf16 elementwise math is emulated/packed."""
    try:
        kind = jax.devices()[0].device_kind.lower()
    except Exception:
        kind = ""
    for tag in ("v5e", "v5 lite", "v5lite", "v4", "v3", "v2"):
        if tag in kind:
            return jnp.float32
    return compute_dtype


class PreparedMLP(NamedTuple):
    weights: Tuple[jax.Array, ...]   # each (Din_pad, Dout_pad), compute_dtype
    biases: Tuple[jax.Array, ...]    # each (1, Dout_pad), float32
    ninput: int
    noutput: int
    compute_dtype: object


def prepare_params(params, compute_dtype=jnp.bfloat16):
    """One-time pad-to-128 and bf16 pre-cast of the weight stack.

    Doing this at parameter-preparation time keeps the whole-stack HBM
    pad/cast traffic out of the per-call hot path.  Zero padding is
    semantics-preserving: padded activation columns stay 0 through
    bias(=0)+ReLU and hit zero-padded weight rows in the next layer.
    NOTE: weights are cast to bf16 here, so results match a bf16-input /
    f32-accumulate matmul, not a pure f32 PyTorch MLP bit-for-bit.
    """
    ninput = params[0][0].shape[0]
    noutput = params[-1][0].shape[1]
    ws, bs = [], []
    for (w, b) in params:
        di, do = w.shape
        dpi, dpo = _round_up(di, _LANE), _round_up(do, _LANE)
        w_p = jnp.zeros((dpi, dpo), compute_dtype).at[:di, :do].set(
            w.astype(compute_dtype))
        b_p = jnp.zeros((1, dpo), jnp.float32).at[:, :do].set(
            b.astype(jnp.float32)[None, :])
        ws.append(w_p)
        bs.append(b_p)
    return PreparedMLP(tuple(ws), tuple(bs), ninput, noutput, compute_dtype)


def _fused_mlp_kernel(x_ref, *refs, nlayers, compute_dtype, act_dtype):
    """Whole MLP on one batch tile; activations stay on-chip between layers."""
    o_ref = refs[-1]
    wb_refs = refs[:-1]                  # (w0, b0, w1, b1, ...)

    h = x_ref[...]                       # (tm, Din_pad)
    for i in range(nlayers):             # static unroll over layers
        w_ref = wb_refs[2 * i]           # (Dpad_in, Dpad_out) compute_dtype
        b_ref = wb_refs[2 * i + 1]       # (1, Dpad_out) f32
        # MXU matmul in compute_dtype (bf16) with f32 accumulation.
        acc = jnp.dot(h.astype(compute_dtype), w_ref[...],
                      preferred_element_type=jnp.float32)
        if i != nlayers - 1:
            # Hidden-layer epilogue in act_dtype: bf16 on v6e/v7x halves vreg
            # pressure / spill of the (tm x D) intermediates; f32 on v5e.
            b = b_ref[...].astype(act_dtype)
            h = jnp.maximum(acc.astype(act_dtype) + b, 0.0)
        else:
            # Final layer: f32 bias add, lane-dense store (Dout padded to 128).
            o_ref[...] = (acc + b_ref[...]).astype(o_ref.dtype)


def _pick_batch_tile(B, vmem_capacity):
    """Batch tile: big enough to amortize per-step overhead, small enough to
    give v7x's two TensorCores >=2 grid steps once tiles are MXU-sized."""
    if B <= 256:
        tm = _round_up(B, _SUBLANE)
        if tm > 128 and _round_up(B, tm) // tm < 2:
            tm = _round_up((B + 1) // 2, _SUBLANE)
        return tm
    # Large-VMEM single-TC parts (v5e/v6e: 128 MiB) can take a 512-row tile;
    # keep 256 otherwise.  Cap at half the batch so the grid has >=2 steps.
    cap = 512 if (vmem_capacity >= 100 * _MiB and B >= 1024) else 256
    return min(cap, _round_up((B + 1) // 2, _SUBLANE))


def mlp_forward_pallas(x, params, *, compute_dtype=jnp.bfloat16, act_dtype=None):
    """x: (B, ninput); params: PreparedMLP or raw [(w, b)] with w: (in, out)."""
    if not isinstance(params, PreparedMLP):
        params = prepare_params(params, compute_dtype)
    prep = params
    compute_dtype = prep.compute_dtype
    if act_dtype is None:
        act_dtype = _default_act_dtype(compute_dtype)

    B, ninput = x.shape
    assert ninput == prep.ninput, (ninput, prep.ninput)
    nlayers = len(prep.weights)
    din_pad = prep.weights[0].shape[0]
    dout_pad = prep.weights[-1].shape[1]
    noutput = prep.noutput

    vmem_capacity = _vmem_capacity_bytes()
    tm = _pick_batch_tile(B, vmem_capacity)
    b_pad = _round_up(B, tm)
    # Padded batch rows flow bias values through all layers (harmless wasted
    # compute) and are sliced off at the end — do NOT remove the final slice.
    x_p = jnp.zeros((b_pad, din_pad), x.dtype).at[:B, :ninput].set(x)

    flat_wb = []
    for w_p, b_p in zip(prep.weights, prep.biases):
        flat_wb += [w_p, b_p]

    itemsize = jnp.dtype(x.dtype).itemsize
    wb_bytes = sum(int(a.size) * jnp.dtype(a.dtype).itemsize for a in flat_wb)
    max_wpad = max(max(w.shape[1] for w in prep.weights), din_pad)
    io_bytes = 2 * tm * din_pad * itemsize + 2 * tm * dout_pad * itemsize
    act_bytes = 2 * tm * max_wpad * 4        # live activation + f32 accumulator

    kernel = functools.partial(_fused_mlp_kernel, nlayers=nlayers,
                               compute_dtype=compute_dtype, act_dtype=act_dtype)

    def build_and_run(single_buffer_weights):
        wb_bufs = 1 if single_buffer_weights else 2
        needed = wb_bufs * wb_bytes + io_bytes + act_bytes
        ceiling = max(32 * _MiB, int(vmem_capacity * 0.8))
        vmem_limit = int(min(ceiling, max(32 * _MiB, int(needed * 1.5) + 4 * _MiB)))

        in_specs = [pl.BlockSpec((tm, din_pad), lambda m: (m, 0))]
        for w_p, b_p in zip(prep.weights, prep.biases):
            if single_buffer_weights:
                # Constant index_map -> never re-fetched across grid steps;
                # a single VMEM buffer halves weight-stack residency.
                in_specs.append(pl.BlockSpec(w_p.shape, lambda m: (0, 0),
                                             pipeline_mode=pl.Buffered(1)))
                in_specs.append(pl.BlockSpec(b_p.shape, lambda m: (0, 0),
                                             pipeline_mode=pl.Buffered(1)))
            else:
                in_specs.append(pl.BlockSpec(w_p.shape, lambda m: (0, 0)))
                in_specs.append(pl.BlockSpec(b_p.shape, lambda m: (0, 0)))

        return pl.pallas_call(
            kernel,
            out_shape=jax.ShapeDtypeStruct((b_pad, dout_pad), x.dtype),
            grid_spec=pl.GridSpec(
                grid=(b_pad // tm,),
                in_specs=in_specs,
                out_specs=pl.BlockSpec((tm, dout_pad), lambda m: (m, 0)),
            ),
            compiler_params=pltpu.CompilerParams(
                # Batch tiles are independent -> shard across TCs on v7x;
                # harmless on single-TC v5e/v6e.
                dimension_semantics=("parallel",),
                vmem_limit_bytes=vmem_limit,
            ),
        )(x_p, *flat_wb)

    try:
        out_p = build_and_run(single_buffer_weights=True)
    except Exception:
        # Fallback if this Pallas build rejects Buffered(1): default buffering.
        out_p = build_and_run(single_buffer_weights=False)

    return out_p[:B, :noutput]


def init_mlp_params(key, ninput, nh, noutput, nlayers, dtype=jnp.float32):
    """Mirrors nn.Linear default init; weights stored as (in, out)."""
    if nlayers == 1:
        dims = [(ninput, noutput)]
    else:
        dims = [(ninput, nh)] + [(nh, nh)] * (nlayers - 2) + [(nh, noutput)]
    params = []
    for (fan_in, fan_out) in dims:
        key, kw, kb = jax.random.split(key, 3)
        bound = 1.0 / math.sqrt(fan_in)
        w = jax.random.uniform(kw, (fan_in, fan_out), dtype, -bound, bound)
        b = jax.random.uniform(kb, (fan_out,), dtype, -bound, bound)
        params.append((w, b))
    return params


def mlp_reference(x, params, compute_dtype=jnp.float32, act_dtype=jnp.float32):
    """Pure-JAX reference mimicking the kernel's dtype schedule."""
    h = x
    n = len(params)
    for i, (w, b) in enumerate(params):
        acc = jnp.dot(h.astype(compute_dtype), w.astype(compute_dtype),
                      preferred_element_type=jnp.float32)
        if i != n - 1:
            h = jnp.maximum(acc.astype(act_dtype) + b.astype(act_dtype), 0.0)
        else:
            h = acc + b.astype(jnp.float32)
    return h


if __name__ == "__main__":
    key = jax.random.PRNGKey(0)
    kx, kp = jax.random.split(key)

    batch = 8
    ninput, nh, noutput, nlayers = 32, 64, 16, 3

    x = jax.random.normal(kx, (batch, ninput), dtype=jnp.float32)
    params = init_mlp_params(kp, ninput, nh, noutput, nlayers)

    prepared = prepare_params(params)              # one-time pad + bf16 cast
    act_dtype = _default_act_dtype(jnp.bfloat16)

    out = jax.block_until_ready(mlp_forward_pallas(x, prepared))
    assert out.shape == (batch, noutput)

    # Check against a reference with the same dtype schedule as the kernel
    # (bf16 MXU inputs, f32 accumulation, act_dtype hidden-layer epilogue).
    ref_matched = mlp_reference(x, params, compute_dtype=jnp.bfloat16,
                                act_dtype=act_dtype)
    max_err = float(jnp.max(jnp.abs(out - ref_matched)))
    assert jnp.allclose(out, ref_matched, atol=5e-3, rtol=5e-3), max_err

    # Loose sanity check against a full-f32 reference.
    ref_f32 = mlp_reference(x, params)
    assert jnp.allclose(out, ref_f32, atol=1e-1, rtol=1e-1)

    # Also exercise the single-layer (nlayers == 1) path with raw params.
    params1 = init_mlp_params(kp, ninput, nh, noutput, 1)
    out1 = jax.block_until_ready(mlp_forward_pallas(x, params1))
    ref1 = mlp_reference(x, params1, compute_dtype=jnp.bfloat16,
                         act_dtype=act_dtype)
    assert out1.shape == (batch, noutput)
    assert jnp.allclose(out1, ref1, atol=5e-3, rtol=5e-3)

    print("KERNEL_OK")
</pallas_src>

<mosaic_0001>
module attributes {stable_mosaic.version = 11 : i64} {
  func.func @_fused_mlp_kernel(%arg0: i32, %arg1: memref<16x128xf32, #tpu.memory_space<vmem>>, %arg2: memref<128x128xbf16, #tpu.memory_space<vmem>>, %arg3: memref<1x128xf32, #tpu.memory_space<vmem>>, %arg4: memref<128x128xbf16, #tpu.memory_space<vmem>>, %arg5: memref<1x128xf32, #tpu.memory_space<vmem>>, %arg6: memref<128x128xbf16, #tpu.memory_space<vmem>>, %arg7: memref<1x128xf32, #tpu.memory_space<vmem>>, %arg8: memref<16x128xf32, #tpu.memory_space<vmem>>) attributes {dimension_semantics = [#tpu.dimension_semantics<parallel>], iteration_bounds = array<i64: 1>, scalar_prefetch = 0 : i64, scratch_operands = 0 : i64, tpu.core_type = #tpu.core_type<tc>, window_params = [{transform_indices = @transform_0, window_bounds = array<i64: 16, 128>}, {pipeline_mode = #tpu.pipeline_mode<synchronous>, transform_indices = @transform_1, window_bounds = array<i64: 128, 128>}, {pipeline_mode = #tpu.pipeline_mode<synchronous>, transform_indices = @transform_2, window_bounds = array<i64: 1, 128>}, {pipeline_mode = #tpu.pipeline_mode<synchronous>, transform_indices = @transform_3, window_bounds = array<i64: 128, 128>}, {pipeline_mode = #tpu.pipeline_mode<synchronous>, transform_indices = @transform_4, window_bounds = array<i64: 1, 128>}, {pipeline_mode = #tpu.pipeline_mode<synchronous>, transform_indices = @transform_5, window_bounds = array<i64: 128, 128>}, {pipeline_mode = #tpu.pipeline_mode<synchronous>, transform_indices = @transform_6, window_bounds = array<i64: 1, 128>}, {transform_indices = @transform_7, window_bounds = array<i64: 16, 128>}]} {
    %c0 = arith.constant 0 : index
    %c0_0 = arith.constant 0 : index
    %0 = vector.load %arg1[%c0, %c0_0] : memref<16x128xf32, #tpu.memory_space<vmem>>, vector<16x128xf32>
    %1 = arith.truncf %0 : vector<16x128xf32> to vector<16x128xbf16>
    %c0_1 = arith.constant 0 : index
    %c0_2 = arith.constant 0 : index
    %2 = vector.load %arg2[%c0_1, %c0_2] : memref<128x128xbf16, #tpu.memory_space<vmem>>, vector<128x128xbf16>
    %cst = arith.constant dense<0.000000e+00> : vector<16x128xf32>
    %3 = tpu.matmul %1, %2, %cst {dimension_numbers = #tpu.dot_dimension_numbers<[1], [0], [0], [1], [0, 0, 1, 1], [], []>} : vector<16x128xbf16>, vector<128x128xbf16>, vector<16x128xf32> -> vector<16x128xf32>
    %c0_3 = arith.constant 0 : index
    %c0_4 = arith.constant 0 : index
    %4 = vector.load %arg3[%c0_3, %c0_4] : memref<1x128xf32, #tpu.memory_space<vmem>>, vector<1x128xf32>
    %5 = arith.truncf %4 : vector<1x128xf32> to vector<1x128xbf16>
    %6 = arith.truncf %3 : vector<16x128xf32> to vector<16x128xbf16>
    %7 = vector.broadcast %5 : vector<1x128xbf16> to vector<16x128xbf16>
    %8 = arith.addf %6, %7 : vector<16x128xbf16>
    %cst_5 = arith.constant 0.000000e+00 : bf16
    %9 = vector.broadcast %cst_5 : bf16 to vector<16x128xbf16>
    %10 = arith.maximumf %8, %9 : vector<16x128xbf16>
    %c0_6 = arith.constant 0 : index
    %c0_7 = arith.constant 0 : index
    %11 = vector.load %arg4[%c0_6, %c0_7] : memref<128x128xbf16, #tpu.memory_space<vmem>>, vector<128x128xbf16>
    %cst_8 = arith.constant dense<0.000000e+00> : vector<16x128xf32>
    %12 = tpu.matmul %10, %11, %cst_8 {dimension_numbers = #tpu.dot_dimension_numbers<[1], [0], [0], [1], [0, 0, 1, 1], [], []>} : vector<16x128xbf16>, vector<128x128xbf16>, vector<16x128xf32> -> vector<16x128xf32>
    %c0_9 = arith.constant 0 : index
    %c0_10 = arith.constant 0 : index
    %13 = vector.load %arg5[%c0_9, %c0_10] : memref<1x128xf32, #tpu.memory_space<vmem>>, vector<1x128xf32>
    %14 = arith.truncf %13 : vector<1x128xf32> to vector<1x128xbf16>
    %15 = arith.truncf %12 : vector<16x128xf32> to vector<16x128xbf16>
    %16 = vector.broadcast %14 : vector<1x128xbf16> to vector<16x128xbf16>
    %17 = arith.addf %15, %16 : vector<16x128xbf16>
    %cst_11 = arith.constant 0.000000e+00 : bf16
    %18 = vector.broadcast %cst_11 : bf16 to vector<16x128xbf16>
    %19 = arith.maximumf %17, %18 : vector<16x128xbf16>
    %c0_12 = arith.constant 0 : index
    %c0_13 = arith.constant 0 : index
    %20 = vector.load %arg6[%c0_12, %c0_13] : memref<128x128xbf16, #tpu.memory_space<vmem>>, vector<128x128xbf16>
    %cst_14 = arith.constant dense<0.000000e+00> : vector<16x128xf32>
    %21 = tpu.matmul %19, %20, %cst_14 {dimension_numbers = #tpu.dot_dimension_numbers<[1], [0], [0], [1], [0, 0, 1, 1], [], []>} : vector<16x128xbf16>, vector<128x128xbf16>, vector<16x128xf32> -> vector<16x128xf32>
    %c0_15 = arith.constant 0 : index
    %c0_16 = arith.constant 0 : index
    %22 = vector.load %arg7[%c0_15, %c0_16] : memref<1x128xf32, #tpu.memory_space<vmem>>, vector<1x128xf32>
    %23 = vector.broadcast %22 : vector<1x128xf32> to vector<16x128xf32>
    %24 = arith.addf %21, %23 : vector<16x128xf32>
    %c0_17 = arith.constant 0 : index
    %c0_18 = arith.constant 0 : index
    %25 = vector.load %arg8[%c0_17, %c0_18] : memref<16x128xf32, #tpu.memory_space<vmem>>, vector<16x128xf32>
    tpu.vector_store %arg8[%c0_17, %c0_18], %24 {strides = array<i32>} : memref<16x128xf32, #tpu.memory_space<vmem>>, vector<16x128xf32>,
    return
  }
  func.func @transform_0(%arg0: i32) -> (i32, i32) {
    %c0_i32 = arith.constant 0 : i32
    %c0_i32_0 = arith.constant 0 : i32
    return %arg0, %c0_i32 : i32, i32
  }
  func.func @transform_1(%arg0: i32) -> (i32, i32) {
    %c0_i32 = arith.constant 0 : i32
    %c0_i32_0 = arith.constant 0 : i32
    %c0_i32_1 = arith.constant 0 : i32
    return %c0_i32, %c0_i32_0 : i32, i32
  }
  func.func @transform_2(%arg0: i32) -> (i32, i32) {
    %c0_i32 = arith.constant 0 : i32
    %c0_i32_0 = arith.constant 0 : i32
    %c0_i32_1 = arith.constant 0 : i32
    return %c0_i32, %c0_i32_0 : i32, i32
  }
  func.func @transform_3(%arg0: i32) -> (i32, i32) {
    %c0_i32 = arith.constant 0 : i32
    %c0_i32_0 = arith.constant 0 : i32
    %c0_i32_1 = arith.constant 0 : i32
    return %c0_i32, %c0_i32_0 : i32, i32
  }
  func.func @transform_4(%arg0: i32) -> (i32, i32) {
    %c0_i32 = arith.constant 0 : i32
    %c0_i32_0 = arith.constant 0 : i32
    %c0_i32_1 = arith.constant 0 : i32
    return %c0_i32, %c0_i32_0 : i32, i32
  }
  func.func @transform_5(%arg0: i32) -> (i32, i32) {
    %c0_i32 = arith.constant 0 : i32
    %c0_i32_0 = arith.constant 0 : i32
    %c0_i32_1 = arith.constant 0 : i32
    return %c0_i32, %c0_i32_0 : i32, i32
  }
  func.func @transform_6(%arg0: i32) -> (i32, i32) {
    %c0_i32 = arith.constant 0 : i32
    %c0_i32_0 = arith.constant 0 : i32
    %c0_i32_1 = arith.constant 0 : i32
    return %c0_i32, %c0_i32_0 : i32, i32
  }
  func.func @transform_7(%arg0: i32) -> (i32, i32) {
    %c0_i32 = arith.constant 0 : i32
    %c0_i32_0 = arith.constant 0 : i32
    return %arg0, %c0_i32 : i32, i32
  }
}

module attributes {stable_mosaic.version = 11 : i64} {
  func.func @_fused_mlp_kernel(%arg0: i32, %arg1: memref<16x128xf32, #tpu.memory_space<vmem>>, %arg2: memref<128x128xbf16, #tpu.memory_space<vmem>>, %arg3: memref<1x128xf32, #tpu.memory_space<vmem>>, %arg4: memref<128x128xbf16, #tpu.memory_space<vmem>>, %arg5: memref<1x128xf32, #tpu.memory_space<vmem>>, %arg6: memref<128x128xbf16, #tpu.memory_space<vmem>>, %arg7: memref<1x128xf32, #tpu.memory_space<vmem>>, %arg8: memref<16x128xf32, #tpu.memory_space<vmem>>) attributes {dimension_semantics = [#tpu.dimension_semantics<parallel>], iteration_bounds = array<i64: 1>, scalar_prefetch = 0 : i64, scratch_operands = 0 : i64, tpu.core_type = #tpu.core_type<tc>, window_params = [{transform_indices = @transform_0, window_bounds = array<i64: 16, 128>}, {pipeline_mode = #tpu.pipeline_mode<synchronous>, transform_indices = @transform_1, window_bounds = array<i64: 128, 128>}, {pipeline_mode = #tpu.pipeline_mode<synchronous>, transform_indices = @transform_2, window_bounds = array<i64: 1, 128>}, {pipeline_mode = #tpu.pipeline_mode<synchronous>, transform_indices = @transform_3, window_bounds = array<i64: 128, 128>}, {pipeline_mode = #tpu.pipeline_mode<synchronous>, transform_indices = @transform_4, window_bounds = array<i64: 1, 128>}, {pipeline_mode = #tpu.pipeline_mode<synchronous>, transform_indices = @transform_5, window_bounds = array<i64: 128, 128>}, {pipeline_mode = #tpu.pipeline_mode<synchronous>, transform_indices = @transform_6, window_bounds = array<i64: 1, 128>}, {transform_indices = @transform_7, window_bounds = array<i64: 16, 128>}]} {
    %c0 = arith.constant 0 : index
    %c0_0 = arith.constant 0 : index
    %0 = vector.load %arg1[%c0, %c0_0] : memref<16x128xf32, #tpu.memory_space<vmem>>, vector<16x128xf32>
    %1 = arith.truncf %0 : vector<16x128xf32> to vector<16x128xbf16>
    %c0_1 = arith.constant 0 : index
    %c0_2 = arith.constant 0 : index
    %2 = vector.load %arg2[%c0_1, %c0_2] : memref<128x128xbf16, #tpu.memory_space<vmem>>, vector<128x128xbf16>
    %cst = arith.constant dense<0.000000e+00> : vector<16x128xf32>
    %3 = tpu.matmul %1, %2, %cst {dimension_numbers = #tpu.dot_dimension_numbers<[1], [0], [0], [1], [0, 0, 1, 1], [], []>} : vector<16x128xbf16>, vector<128x128xbf16>, vector<16x128xf32> -> vector<16x128xf32>
    %c0_3 = arith.constant 0 : index
    %c0_4 = arith.constant 0 : index
    %4 = vector.load %arg3[%c0_3, %c0_4] : memref<1x128xf32, #tpu.memory_space<vmem>>, vector<1x128xf32>
    %5 = arith.truncf %4 : vector<1x128xf32> to vector<1x128xbf16>
    %6 = arith.truncf %3 : vector<16x128xf32> to vector<16x128xbf16>
    %7 = vector.broadcast %5 : vector<1x128xbf16> to vector<16x128xbf16>
    %8 = arith.addf %6, %7 : vector<16x128xbf16>
    %cst_5 = arith.constant 0.000000e+00 : bf16
    %9 = vector.broadcast %cst_5 : bf16 to vector<16x128xbf16>
    %10 = arith.maximumf %8, %9 : vector<16x128xbf16>
    %c0_6 = arith.constant 0 : index
    %c0_7 = arith.constant 0 : index
    %11 = vector.load %arg4[%c0_6, %c0_7] : memref<128x128xbf16, #tpu.memory_space<vmem>>, vector<128x128xbf16>
    %cst_8 = arith.constant dense<0.000000e+00> : vector<16x128xf32>
    %12 = tpu.matmul %10, %11, %cst_8 {dimension_numbers = #tpu.dot_dimension_numbers<[1], [0], [0], [1], [0, 0, 1, 1], [], []>} : vector<16x128xbf16>, vector<128x128xbf16>, vector<16x128xf32> -> vector<16x128xf32>
    %c0_9 = arith.constant 0 : index
    %c0_10 = arith.constant 0 : index
    %13 = vector.load %arg5[%c0_9, %c0_10] : memref<1x128xf32, #tpu.memory_space<vmem>>, vector<1x128xf32>
    %14 = arith.truncf %13 : vector<1x128xf32> to vector<1x128xbf16>
    %15 = arith.truncf %12 : vector<16x128xf32> to vector<16x128xbf16>
    %16 = vector.broadcast %14 : vector<1x128xbf16> to vector<16x128xbf16>
    %17 = arith.addf %15, %16 : vector<16x128xbf16>
    %cst_11 = arith.constant 0.000000e+00 : bf16
    %18 = vector.broadcast %cst_11 : bf16 to vector<16x128xbf16>
    %19 = arith.maximumf %17, %18 : vector<16x128xbf16>
    %c0_12 = arith.constant 0 : index
    %c0_13 = arith.constant 0 : index
    %20 = vector.load %arg6[%c0_12, %c0_13] : memref<128x128xbf16, #tpu.memory_space<vmem>>, vector<128x128xbf16>
    %cst_14 = arith.constant dense<0.000000e+00> : vector<16x128xf32>
    %21 = tpu.matmul %19, %20, %cst_14 {dimension_numbers = #tpu.dot_dimension_numbers<[1], [0], [0], [1], [0, 0, 1, 1], [], []>} : vector<16x128xbf16>, vector<128x128xbf16>, vector<16x128xf32> -> vector<16x128xf32>
    %c0_15 = arith.constant 0 : index
    %c0_16 = arith.constant 0 : index
    %22 = vector.load %arg7[%c0_15, %c0_16] : memref<1x128xf32, #tpu.memory_space<vmem>>, vector<1x128xf32>
    %23 = vector.broadcast %22 : vector<1x128xf32> to vector<16x128xf32>
    %24 = arith.addf %21, %23 : vector<16x128xf32>
    %c0_17 = arith.constant 0 : index
    %c0_18 = arith.constant 0 : index
    %25 = vector.load %arg8[%c0_17, %c0_18] : memref<16x128xf32, #tpu.memory_space<vmem>>, vector<16x128xf32>
    tpu.vector_store %arg8[%c0_17, %c0_18], %24 {strides = array<i32>} : memref<16x128xf32, #tpu.memory_space<vmem>>, vector<16x128xf32>,
    return
  }
  func.func @transform_0(%arg0: i32) -> (i32, i32) {
    %c0_i32 = arith.constant 0 : i32
    %c0_i32_0 = arith.constant 0 : i32
    return %arg0, %c0_i32 : i32, i32
  }
  func.func @transform_1(%arg0: i32) -> (i32, i32) {
    %c0_i32 = arith.constant 0 : i32
    %c0_i32_0 = arith.constant 0 : i32
    %c0_i32_1 = arith.constant 0 : i32
    return %c0_i32, %c0_i32_0 : i32, i32
  }
  func.func @transform_2(%arg0: i32) -> (i32, i32) {
    %c0_i32 = arith.constant 0 : i32
    %c0_i32_0 = arith.constant 0 : i32
    %c0_i32_1 = arith.constant 0 : i32
    return %c0_i32, %c0_i32_0 : i32, i32
  }
  func.func @transform_3(%arg0: i32) -> (i32, i32) {
    %c0_i32 = arith.constant 0 : i32
    %c0_i32_0 = arith.constant 0 : i32
    %c0_i32_1 = arith.constant 0 : i32
    return %c0_i32, %c0_i32_0 : i32, i32
  }
  func.func @transform_4(%arg0: i32) -> (i32, i32) {
    %c0_i32 = arith.constant 0 : i32
    %c0_i32_0 = arith.constant 0 : i32
    %c0_i32_1 = arith.constant 0 : i32
    return %c0_i32, %c0_i32_0 : i32, i32
  }
  func.func @transform_5(%arg0: i32) -> (i32, i32) {
    %c0_i32 = arith.constant 0 : i32
    %c0_i32_0 = arith.constant 0 : i32
    %c0_i32_1 = arith.constant 0 : i32
    return %c0_i32, %c0_i32_0 : i32, i32
  }
  func.func @transform_6(%arg0: i32) -> (i32, i32) {
    %c0_i32 = arith.constant 0 : i32
    %c0_i32_0 = arith.constant 0 : i32
    %c0_i32_1 = arith.constant 0 : i32
    return %c0_i32, %c0_i32_0 : i32, i32
  }
  func.func @transform_7(%arg0: i32) -> (i32, i32) {
    %c0_i32 = arith.constant 0 : i32
    %c0_i32_0 = arith.constant 0 : i32
    return %arg0, %c0_i32 : i32, i32
  }
}

</mosaic_0001>

<bundles_post_ra>
// kernel: tpu_custom_call.1
= control target key start
LH: loop header
LB: loop body
LE: loop exit
PB: predicated region body
PF: predicated region fallthrough
CT: control target
= control target key end

     0   :  { %12 = vsyncpa [#allocation3], 0  ;;  %s830_s0 = inlined_call_operand.hbm [shape: f32[16,128], index: 0, kind: input, shape index: {}]   ;;  %s831_s1 = inlined_call_operand.hbm [shape: bf16[128,128], index: 1, kind: input, shape index: {}]   ;;  %s832_s2 = inlined_call_operand.vmem [shape: f32[1,128], index: 2, kind: input, shape index: {}]   ;;  %s833_s3 = inlined_call_operand.hbm [shape: bf16[128,128], index: 3, kind: input, shape index: {}]   ;;  %s834_s4 = inlined_call_operand.vmem [shape: f32[1,128], index: 4, kind: input, shape index: {}]   ;;  %s835_s5 = inlined_call_operand.hbm [shape: bf16[128,128], index: 5, kind: input, shape index: {}]   ;;  %s836_s6 = inlined_call_operand.vmem [shape: f32[1,128], index: 6, kind: input, shape index: {}]   ;;  %s837_s7 = inlined_call_operand.hbm [shape: f32[16,128], index: 7, kind: output, shape index: {}]  }
   0x1   :  { %13 = vsyncpa [#allocation6], 0 }
   0x2   :  { %14 = vsyncpa [#allocation9], 0 }
   0x3   :  { %15 = vsyncpa [#allocation4], 0  ;;  %s709_s24 = smov [#allocation5]  }
   0x4   :  { %s33_s25 = sshll.u32 %s709_s24, 4  ;;  %s34_s25 = int_to_ptr.vmem [resolvable:$true] %s33_s25 }
   0x5   :  { %s609_s26 = scalar_lea.vmem %s34_s25, 1024  ;;  %p614_p1 = scmp.lt.s32.totalorder %s34_s25, %s34_s25 }
   0x6   :  { %p610_p0 = scmp.ne.s32.totalorder %s34_s25, %s609_s26  ;;  %p615_p2 = scmp.lt.s32.totalorder %s609_s26, %s609_s26 }
   0x8   :  { %p616_p3 = por %p615_p2, %p614_p1 }
   0xa   :  { %p617_p4 = pnand %p616_p3, %p610_p0 }
   0xc   :  { %620 = shalt.err (!%p617_p4)
}
   0xd   :  { %s710_s27 = smov 64   ;;  %s711_s28 = smov 4  }
   0xe   :  { %39 = dma.hbm_to_vmem [thread:$0]  %s831_s1, 1024, %s34_s25, [#allocation6], %s710_s27, %s710_s27, %s711_s28  }
   0xf   :  { %s712_s8 = smov [#allocation2]  }
  0x10   :  { %s21_s9 = sshll.u32 %s712_s8, 4  ;;  %s22_s9 = int_to_ptr.vmem [resolvable:$true] %s21_s9 }
  0x11   :  { %s629_s10 = scalar_lea.vmem %s22_s9, 256  ;;  %p634_p6 = scmp.lt.s32.totalorder %s22_s9, %s22_s9 }
  0x12   :  { %p630_p5 = scmp.ne.s32.totalorder %s22_s9, %s629_s10  ;;  %p635_p7 = scmp.lt.s32.totalorder %s629_s10, %s629_s10 }
  0x14   :  { %p636_p8 = por %p635_p7, %p634_p6 }
  0x16   :  { %p637_p9 = pnand %p636_p8, %p630_p5 }
  0x18   :  { %640 = shalt.err (!%p637_p9)
}
  0x19   :  { %s713_s11 = smov 128   ;;  %s714_s12 = smov 8  }
  0x1a   :  { %27 = dma.hbm_to_vmem [thread:$0]  %s830_s0, 256, %s22_s9, [#allocation3], %s713_s11, %s713_s11, %s714_s12  }
  0x1b   :  { %s715_s1 = smov [#allocation7]   ;;  %s716_s16 = smov [#allocation8]  }
  0x1c   :  { %s47_s15 = sshll.u32 %s715_s1, 4  ;;  %s61_s17 = sshll.u32 %s716_s16, 4  ;;  %s48_s15 = int_to_ptr.vmem [resolvable:$true] %s47_s15  ;;  %s62_s17 = int_to_ptr.vmem [resolvable:$true] %s61_s17 }
  0x1d   :  { %s649_s18 = scalar_lea.vmem %s48_s15, 1024  ;;  %p654_p11 = scmp.lt.s32.totalorder %s48_s15, %s48_s15 }
  0x1e   :  { %p650_p10 = scmp.ne.s32.totalorder %s48_s15, %s649_s18  ;;  %p655_p12 = scmp.lt.s32.totalorder %s649_s18, %s649_s18 }
  0x20   :  { %p656_p13 = por %p655_p12, %p654_p11 }
  0x22   :  { %p657_p0 = pnand %p656_p13, %p650_p10 }
  0x24   :  { %660 = shalt.err (!%p657_p0)
}
  0x25   :  { %53 = dma.hbm_to_vmem [thread:$0]  %s833_s3, 1024, %s48_s15, [#allocation6], %s710_s27, %s710_s27, %s711_s28  }
  0x26   :  { %s669_s0 = scalar_lea.vmem %s62_s17, 1024  ;;  %p674_p2 = scmp.lt.s32.totalorder %s62_s17, %s62_s17 }
  0x27   :  { %p670_p1 = scmp.ne.s32.totalorder %s62_s17, %s669_s0  ;;  %p675_p3 = scmp.lt.s32.totalorder %s669_s0, %s669_s0 }
  0x29   :  { %p676_p4 = por %p675_p3, %p674_p2 }
  0x2b   :  { %p677_p5 = pnand %p676_p4, %p670_p1 }
  0x2d   :  { %680 = shalt.err (!%p677_p5)
}
  0x2e   :  { %67 = dma.hbm_to_vmem [thread:$0]  %s835_s5, 1024, %s62_s17, [#allocation9], %s710_s27, %s710_s27, %s711_s28  }
  0x2f   :  { %701 = dma.done.wait [#allocation3], 256  }
  0x30   :  { %702 = vsyncadd [#allocation3], 4294967040 }
  0x31   :  { %703 = dma.done.wait [#allocation6], 2048  }
  0x32   :  { %704 = vsyncadd [#allocation6], 4294965248 }
  0x33   :  { %705 = dma.done.wait [#allocation9], 1024  }
  0x34   :  { %706 = vsyncadd [#allocation9], 4294966272  ;;  %v717_v0 = vmov 0.0   ;;  %vm718_vm0 = vmmov 0   ;;  %v577_v1 = vld [vmem:[#allocation5 + $0x38] sm:$0xff]   ;;  %v578_v2 = vld [vmem:[#allocation5 + $0x30] sm:$0xff]   ;;  %v197_v25 = vlaneseq }
  0x35   :  { %505 = vmatprep.subr.bf16.mxu0 %v717_v0  ;;  %521 = vmatprep.mubr.msk.bf16.mxu0 %vm718_vm0, %v717_v0  ;;  %v579_v3 = vld [vmem:[#allocation5 + $0x28] sm:$0xff]   ;;  %v585_v4 = vld [vmem:[#allocation7 + $0x38] sm:$0xff]   ;;  %v580_v5 = vld [vmem:[#allocation5 + $0x20] sm:$0xff]   ;;  %v719_v38 = vmov 0   ;;  %s720_s26 = smov [#allocation10]  }
  0x36   :  { %525 = vmatprep.subr.bf16.mxu1 %v717_v0  ;;  %541 = vmatprep.mubr.msk.bf16.mxu1 %vm718_vm0, %v717_v0  ;;  %v586_v6 = vld [vmem:[#allocation7 + $0x30] sm:$0xff]   ;;  %v581_v7 = vld [vmem:[#allocation5 + $0x18] sm:$0xff]   ;;  %v587_v8 = vld [vmem:[#allocation7 + $0x28] sm:$0xff]   ;;  %v198_v28 = vshrl.u32 %v197_v25, 7 }
  0x37   :  { %506 = vmatpush3.bf16.msra.mxu0 %v577_v1  ;;  %526 = vmatpush3.bf16.msra.mxu1 %v585_v4  ;;  %v582_v9 = vld [vmem:[#allocation5 + $0x10] sm:$0xff]   ;;  %v588_v10 = vld [vmem:[#allocation7 + $0x20] sm:$0xff]   ;;  %v583_v11 = vld [vmem:[#allocation5 + $0x8] sm:$0xff]  }
  0x38   :  { %507 = vmatprep.subr.bf16.mxu0 %v717_v0  ;;  %527 = vmatprep.subr.bf16.mxu1 %v717_v0  ;;  %v589_v12 = vld [vmem:[#allocation7 + $0x18] sm:$0xff]   ;;  %v584_v13 = vld [vmem:[#allocation5] sm:$0xff]   ;;  %v83_v14 = vld [vmem:[#allocation2] sm:$0xff]  ;;  %v199_v30 = vsub.s32 0, %v198_v28 }
  0x39   :  { %v84_v15 = vld [vmem:[#allocation2 + $0x8] sm:$0xff]  ;;  %v590_v17 = vld [vmem:[#allocation7 + $0x10] sm:$0xff]   ;;  %v591_v18 = vld [vmem:[#allocation7 + $0x8] sm:$0xff]  }
  0x3a   :  { %v85_v16 = vpack.c.bf16 %v84_v15, %v83_v14  ;;  %v592_v19 = vld [vmem:[#allocation7] sm:$0xff]   ;;  %v593_v20 = vld [vmem:[#allocation8 + $0x38] sm:$0xff]   ;;  %v594_v21 = vld [vmem:[#allocation8 + $0x30] sm:$0xff]  }
  0x3b   :  { %508 = vmatpush3.bf16.msra.mxu0 %v578_v2  ;;  %528 = vmatpush3.bf16.msra.mxu1 %v586_v6  ;;  %v595_v22 = vld [vmem:[#allocation8 + $0x28] sm:$0xff]   ;;  %v596_v23 = vld [vmem:[#allocation8 + $0x20] sm:$0xff]   ;;  %v597_v24 = vld [vmem:[#allocation8 + $0x18] sm:$0xff]  }
  0x3c   :  { %509 = vmatprep.subr.bf16.mxu0 %v717_v0  ;;  %529 = vmatprep.subr.bf16.mxu1 %v717_v0  ;;  %v191_v26 = vld [vmem:[%s832_s2] sm:$0x1]  ;;  %v599_v41 = vld [vmem:[#allocation8 + $0x8] sm:$0xff]   ;;  %v600_v42 = vld [vmem:[#allocation8] sm:$0xff]  }
  0x3d   :  { %v192_v27 = vpack.c.bf16 %v191_v26, %v191_v26  ;;  %v598_v40 = vld [vmem:[#allocation8 + $0x10] sm:$0xff]  }
  0x3e   :  { %v308_v43 = vld [vmem:[%s834_s4] sm:$0x1]  ;;  %s439_s4 = sshll.u32 %s720_s26, 4  ;;  %s440_s4 = int_to_ptr.vmem [resolvable:$true] %s439_s4 }
  0x3f   :  { %510 = vmatpush3.bf16.msra.mxu0 %v579_v3  ;;  %530 = vmatpush3.bf16.msra.mxu1 %v587_v8  ;;  %v195_v29 = vpack.i.b16 %v192_v27, %v192_v27  ;;  %v309_v44 = vpack.c.bf16 %v308_v43, %v308_v43  ;;  %v469_v54 = vld [vmem:[%s836_s6] ss:$0 sm:$0xff]  ;;  %s681_s27 = scalar_lea.vmem %s440_s4, 256  ;;  %p686_p7 = scmp.lt.s32.totalorder %s440_s4, %s440_s4 }
  0x40   :  { %511 = vmatprep.subr.bf16.mxu0 %v717_v0  ;;  %531 = vmatprep.subr.bf16.mxu1 %v717_v0  ;;  %p682_p6 = scmp.ne.s32.totalorder %s440_s4, %s681_s27  ;;  %p687_p8 = scmp.lt.s32.totalorder %s681_s27, %s681_s27 }
  0x41   :  { %v200_v33 = vrot.slane %v195_v29, %v199_v30  ;;  %v312_v45 = vpack.i.b16 %v309_v44, %v309_v44 }
  0x42   :  { %p688_p9 = por %p687_p8, %p686_p7 }
  0x43   :  { %512 = vmatpush3.bf16.msra.mxu0 %v580_v5  ;;  %532 = vmatpush3.bf16.msra.mxu1 %v588_v10  ;;  %v317_v48 = vrot.slane %v312_v45, %v199_v30 }
  0x44   :  { %513 = vmatprep.subr.bf16.mxu0 %v717_v0  ;;  %533 = vmatprep.subr.bf16.mxu1 %v717_v0  ;;  %p689_p10 = pnand %p688_p9, %p682_p6 }
  0x47   :  { %514 = vmatpush3.bf16.msra.mxu0 %v581_v7  ;;  %534 = vmatpush3.bf16.msra.mxu1 %v589_v12 }
  0x48   :  { %515 = vmatprep.subr.bf16.mxu0 %v717_v0  ;;  %535 = vmatprep.subr.bf16.mxu1 %v717_v0 }
  0x4b   :  { %516 = vmatpush3.bf16.msra.mxu0 %v582_v9  ;;  %536 = vmatpush3.bf16.msra.mxu1 %v590_v17 }
  0x4c   :  { %517 = vmatprep.subr.bf16.mxu0 %v717_v0  ;;  %537 = vmatprep.subr.bf16.mxu1 %v717_v0 }
  0x4f   :  { %518 = vmatpush3.bf16.msra.mxu0 %v583_v11  ;;  %538 = vmatpush3.bf16.msra.mxu1 %v591_v18 }
  0x50   :  { %519 = vmatprep.subr.bf16.mxu0 %v717_v0  ;;  %539 = vmatprep.subr.bf16.mxu1 %v717_v0 }
  0x53   :  { %520 = vmatpush3.bf16.msra.mxu0 %v584_v13  ;;  %540 = vmatpush3.bf16.msra.mxu1 %v592_v19 }
  0x54   :  { %545 = vmatprep.subr.bf16.mxu0 %v717_v0 }
  0x56   :  { %522 = vmatmul.mubr.bf16.vlgmr.msra.gmra.mxu0 %v85_v16 }
  0x57   :  { %561 = vmatprep.mubr.msk.bf16.mxu0 %vm718_vm0, %v717_v0  ;;  %546 = vmatpush3.bf16.msra.mxu0 %v593_v20 }
  0x58   :  { %547 = vmatprep.subr.bf16.mxu0 %v717_v0 }
  0x5b   :  { %548 = vmatpush3.bf16.msra.mxu0 %v594_v21 }
  0x5c   :  { %549 = vmatprep.subr.bf16.mxu0 %v717_v0 }
  0x5f   :  { %550 = vmatpush3.bf16.msra.mxu0 %v595_v22 }
  0x60   :  { %551 = vmatprep.subr.bf16.mxu0 %v717_v0 }
  0x63   :  { %552 = vmatpush3.bf16.msra.mxu0 %v596_v23 }
  0x64   :  { %553 = vmatprep.subr.bf16.mxu0 %v717_v0 }
  0x67   :  { %554 = vmatpush3.bf16.msra.mxu0 %v597_v24 }
  0x68   :  { %555 = vmatprep.subr.bf16.mxu0 %v717_v0 }
  0x6b   :  { %556 = vmatpush3.bf16.msra.mxu0 %v598_v40 }
  0x6c   :  { %557 = vmatprep.subr.bf16.mxu0 %v717_v0 }
  0x6f   :  { %558 = vmatpush3.bf16.msra.mxu0 %v599_v41 }
  0x70   :  { %559 = vmatprep.subr.bf16.mxu0 %v717_v0 }
  0x73   :  { %560 = vmatpush3.bf16.msra.mxu0 %v600_v42 }
 0x116   :  { %v184_v31 = vpop.f32.mrf.mxu0 }
 0x118   :  { %v523_v32 = vpop.f32.mrf.mxu0 }
 0x11a   :  { %v187_v34 = vpop.f32.mrf.mxu0 }
 0x11b   :  { %v193_v35 = vpack.c.bf16 %v187_v34, %v184_v31 }
 0x11c   :  { %v524_v36 = vpop.f32.mrf.mxu0 }
 0x11d   :  { %v201_v37 = vadd.bf16 %v200_v33, %v193_v35 }
 0x11f   :  { %v202_v39 = vmax.bf16 %v719_v38, %v201_v37 }
 0x121   :  { %542 = vmatmul.mubr.bf16.vlgmr.msra.gmra.mxu1 %v202_v39 }
 0x1e1   :  { %v301_v46 = vpop.f32.mrf.mxu1 }
 0x1e3   :  { %v543_v47 = vpop.f32.mrf.mxu1 }
 0x1e5   :  { %v304_v49 = vpop.f32.mrf.mxu1 }
 0x1e6   :  { %v310_v50 = vpack.c.bf16 %v304_v49, %v301_v46 }
 0x1e7   :  { %v544_v51 = vpop.f32.mrf.mxu1 }
 0x1e8   :  { %v318_v52 = vadd.bf16 %v317_v48, %v310_v50 }
 0x1ea   :  { %v319_v53 = vmax.bf16 %v719_v38, %v318_v52 }
 0x1ec   :  { %562 = vmatmul.mubr.bf16.vlgmr.msra.gmra.mxu0 %v319_v53 }
 0x2ac   :  { %v425_v55 = vpop.f32.mrf.mxu0 }
 0x2ad   :  { %v426_v56 = vadd.f32 %v469_v54, %v425_v55 }
 0x2ae   :  { %v563_v57 = vpop.f32.mrf.mxu0 }
 0x2af   :  { %432 = vst [vmem:[#allocation10] sm:$0xff] %v426_v56 }
 0x2b0   :  { %v428_v58 = vpop.f32.mrf.mxu0 }
 0x2b1   :  { %v429_v59 = vadd.f32 %v469_v54, %v428_v58 }
 0x2b2   :  { %v564_v60 = vpop.f32.mrf.mxu0 }
 0x2b3   :  { %433 = vst [vmem:[#allocation10 + $0x8] sm:$0xff] %v429_v59 }
 0x2b4   :  { %692 = shalt.err (!%p689_p10)
}
 0x2b5   :  { %445 = dma.vmem_to_hbm [thread:$0]  %s440_s4, 256, %s837_s7, [#allocation4], %s713_s11, %s713_s11, %s714_s12  }
 0x2b6   :  { %707 = dma.done.wait [#allocation4], 256  }
 0x2b7   :  { %708 = vsyncadd [#allocation4], 4294967040 }
 0x2b8   :  { %449 = vsyncpa [#allocation3], 1 }
 0x2b9   :  { %450 = vsyncpa [#allocation6], 1 }
 0x2ba   :  { %451 = vsyncpa [#allocation9], 1 }
 0x2bb   :  { %452 = vsyncpa [#allocation4], 1 }

// kernel: tpu_custom_call.1
= control target key start
LH: loop header
LB: loop body
LE: loop exit
PB: predicated region body
PF: predicated region fallthrough
CT: control target
= control target key end

     0   :  { %12 = vsyncpa [#allocation3], 0  ;;  %s830_s0 = inlined_call_operand.hbm [shape: f32[16,128], index: 0, kind: input, shape index: {}]   ;;  %s831_s1 = inlined_call_operand.hbm [shape: bf16[128,128], index: 1, kind: input, shape index: {}]   ;;  %s832_s2 = inlined_call_operand.vmem [shape: f32[1,128], index: 2, kind: input, shape index: {}]   ;;  %s833_s3 = inlined_call_operand.hbm [shape: bf16[128,128], index: 3, kind: input, shape index: {}]   ;;  %s834_s4 = inlined_call_operand.vmem [shape: f32[1,128], index: 4, kind: input, shape index: {}]   ;;  %s835_s5 = inlined_call_operand.hbm [shape: bf16[128,128], index: 5, kind: input, shape index: {}]   ;;  %s836_s6 = inlined_call_operand.vmem [shape: f32[1,128], index: 6, kind: input, shape index: {}]   ;;  %s837_s7 = inlined_call_operand.hbm [shape: f32[16,128], index: 7, kind: output, shape index: {}]  }
   0x1   :  { %13 = vsyncpa [#allocation6], 0 }
   0x2   :  { %14 = vsyncpa [#allocation9], 0 }
   0x3   :  { %15 = vsyncpa [#allocation4], 0  ;;  %s709_s24 = smov [#allocation5]  }
   0x4   :  { %s33_s25 = sshll.u32 %s709_s24, 4  ;;  %s34_s25 = int_to_ptr.vmem [resolvable:$true] %s33_s25 }
   0x5   :  { %s609_s26 = scalar_lea.vmem %s34_s25, 1024  ;;  %p614_p1 = scmp.lt.s32.totalorder %s34_s25, %s34_s25 }
   0x6   :  { %p610_p0 = scmp.ne.s32.totalorder %s34_s25, %s609_s26  ;;  %p615_p2 = scmp.lt.s32.totalorder %s609_s26, %s609_s26 }
   0x8   :  { %p616_p3 = por %p615_p2, %p614_p1 }
   0xa   :  { %p617_p4 = pnand %p616_p3, %p610_p0 }
   0xc   :  { %620 = shalt.err (!%p617_p4)
}
   0xd   :  { %s710_s27 = smov 64   ;;  %s711_s28 = smov 4  }
   0xe   :  { %39 = dma.hbm_to_vmem [thread:$0]  %s831_s1, 1024, %s34_s25, [#allocation6], %s710_s27, %s710_s27, %s711_s28  }
   0xf   :  { %s712_s8 = smov [#allocation2]  }
  0x10   :  { %s21_s9 = sshll.u32 %s712_s8, 4  ;;  %s22_s9 = int_to_ptr.vmem [resolvable:$true] %s21_s9 }
  0x11   :  { %s629_s10 = scalar_lea.vmem %s22_s9, 256  ;;  %p634_p6 = scmp.lt.s32.totalorder %s22_s9, %s22_s9 }
  0x12   :  { %p630_p5 = scmp.ne.s32.totalorder %s22_s9, %s629_s10  ;;  %p635_p7 = scmp.lt.s32.totalorder %s629_s10, %s629_s10 }
  0x14   :  { %p636_p8 = por %p635_p7, %p634_p6 }
  0x16   :  { %p637_p9 = pnand %p636_p8, %p630_p5 }
  0x18   :  { %640 = shalt.err (!%p637_p9)
}
  0x19   :  { %s713_s11 = smov 128   ;;  %s714_s12 = smov 8  }
  0x1a   :  { %27 = dma.hbm_to_vmem [thread:$0]  %s830_s0, 256, %s22_s9, [#allocation3], %s713_s11, %s713_s11, %s714_s12  }
  0x1b   :  { %s715_s1 = smov [#allocation7]   ;;  %s716_s16 = smov [#allocation8]  }
  0x1c   :  { %s47_s15 = sshll.u32 %s715_s1, 4  ;;  %s61_s17 = sshll.u32 %s716_s16, 4  ;;  %s48_s15 = int_to_ptr.vmem [resolvable:$true] %s47_s15  ;;  %s62_s17 = int_to_ptr.vmem [resolvable:$true] %s61_s17 }
  0x1d   :  { %s649_s18 = scalar_lea.vmem %s48_s15, 1024  ;;  %p654_p11 = scmp.lt.s32.totalorder %s48_s15, %s48_s15 }
  0x1e   :  { %p650_p10 = scmp.ne.s32.totalorder %s48_s15, %s649_s18  ;;  %p655_p12 = scmp.lt.s32.totalorder %s649_s18, %s649_s18 }
  0x20   :  { %p656_p13 = por %p655_p12, %p654_p11 }
  0x22   :  { %p657_p0 = pnand %p656_p13, %p650_p10 }
  0x24   :  { %660 = shalt.err (!%p657_p0)
}
  0x25   :  { %53 = dma.hbm_to_vmem [thread:$0]  %s833_s3, 1024, %s48_s15, [#allocation6], %s710_s27, %s710_s27, %s711_s28  }
  0x26   :  { %s669_s0 = scalar_lea.vmem %s62_s17, 1024  ;;  %p674_p2 = scmp.lt.s32.totalorder %s62_s17, %s62_s17 }
  0x27   :  { %p670_p1 = scmp.ne.s32.totalorder %s62_s17, %s669_s0  ;;  %p675_p3 = scmp.lt.s32.totalorder %s669_s0, %s669_s0 }
  0x29   :  { %p676_p4 = por %p675_p3, %p674_p2 }
  0x2b   :  { %p677_p5 = pnand %p676_p4, %p670_p1 }
  0x2d   :  { %680 = shalt.err (!%p677_p5)
}
  0x2e   :  { %67 = dma.hbm_to_vmem [thread:$0]  %s835_s5, 1024, %s62_s17, [#allocation9], %s710_s27, %s710_s27, %s711_s28  }
  0x2f   :  { %701 = dma.done.wait [#allocation3], 256  }
  0x30   :  { %702 = vsyncadd [#allocation3], 4294967040 }
  0x31   :  { %703 = dma.done.wait [#allocation6], 2048  }
  0x32   :  { %704 = vsyncadd [#allocation6], 4294965248 }
  0x33   :  { %705 = dma.done.wait [#allocation9], 1024  }
  0x34   :  { %706 = vsyncadd [#allocation9], 4294966272  ;;  %v717_v0 = vmov 0.0   ;;  %vm718_vm0 = vmmov 0   ;;  %v577_v1 = vld [vmem:[#allocation5 + $0x38] sm:$0xff]   ;;  %v578_v2 = vld [vmem:[#allocation5 + $0x30] sm:$0xff]   ;;  %v197_v25 = vlaneseq }
  0x35   :  { %505 = vmatprep.subr.bf16.mxu0 %v717_v0  ;;  %521 = vmatprep.mubr.msk.bf16.mxu0 %vm718_vm0, %v717_v0  ;;  %v579_v3 = vld [vmem:[#allocation5 + $0x28] sm:$0xff]   ;;  %v585_v4 = vld [vmem:[#allocation7 + $0x38] sm:$0xff]   ;;  %v580_v5 = vld [vmem:[#allocation5 + $0x20] sm:$0xff]   ;;  %v719_v38 = vmov 0   ;;  %s720_s26 = smov [#allocation10]  }
  0x36   :  { %525 = vmatprep.subr.bf16.mxu1 %v717_v0  ;;  %541 = vmatprep.mubr.msk.bf16.mxu1 %vm718_vm0, %v717_v0  ;;  %v586_v6 = vld [vmem:[#allocation7 + $0x30] sm:$0xff]   ;;  %v581_v7 = vld [vmem:[#allocation5 + $0x18] sm:$0xff]   ;;  %v587_v8 = vld [vmem:[#allocation7 + $0x28] sm:$0xff]   ;;  %v198_v28 = vshrl.u32 %v197_v25, 7 }
  0x37   :  { %506 = vmatpush3.bf16.msra.mxu0 %v577_v1  ;;  %526 = vmatpush3.bf16.msra.mxu1 %v585_v4  ;;  %v582_v9 = vld [vmem:[#allocation5 + $0x10] sm:$0xff]   ;;  %v588_v10 = vld [vmem:[#allocation7 + $0x20] sm:$0xff]   ;;  %v583_v11 = vld [vmem:[#allocation5 + $0x8] sm:$0xff]  }
  0x38   :  { %507 = vmatprep.subr.bf16.mxu0 %v717_v0  ;;  %527 = vmatprep.subr.bf16.mxu1 %v717_v0  ;;  %v589_v12 = vld [vmem:[#allocation7 + $0x18] sm:$0xff]   ;;  %v584_v13 = vld [vmem:[#allocation5] sm:$0xff]   ;;  %v83_v14 = vld [vmem:[#allocation2] sm:$0xff]  ;;  %v199_v30 = vsub.s32 0, %v198_v28 }
  0x39   :  { %v84_v15 = vld [vmem:[#allocation2 + $0x8] sm:$0xff]  ;;  %v590_v17 = vld [vmem:[#allocation7 + $0x10] sm:$0xff]   ;;  %v591_v18 = vld [vmem:[#allocation7 + $0x8] sm:$0xff]  }
  0x3a   :  { %v85_v16 = vpack.c.bf16 %v84_v15, %v83_v14  ;;  %v592_v19 = vld [vmem:[#allocation7] sm:$0xff]   ;;  %v593_v20 = vld [vmem:[#allocation8 + $0x38] sm:$0xff]   ;;  %v594_v21 = vld [vmem:[#allocation8 + $0x30] sm:$0xff]  }
  0x3b   :  { %508 = vmatpush3.bf16.msra.mxu0 %v578_v2  ;;  %528 = vmatpush3.bf16.msra.mxu1 %v586_v6  ;;  %v595_v22 = vld [vmem:[#allocation8 + $0x28] sm:$0xff]   ;;  %v596_v23 = vld [vmem:[#allocation8 + $0x20] sm:$0xff]   ;;  %v597_v24 = vld [vmem:[#allocation8 + $0x18] sm:$0xff]  }
  0x3c   :  { %509 = vmatprep.subr.bf16.mxu0 %v717_v0  ;;  %529 = vmatprep.subr.bf16.mxu1 %v717_v0  ;;  %v191_v26 = vld [vmem:[%s832_s2] sm:$0x1]  ;;  %v599_v41 = vld [vmem:[#allocation8 + $0x8] sm:$0xff]   ;;  %v600_v42 = vld [vmem:[#allocation8] sm:$0xff]  }
  0x3d   :  { %v192_v27 = vpack.c.bf16 %v191_v26, %v191_v26  ;;  %v598_v40 = vld [vmem:[#allocation8 + $0x10] sm:$0xff]  }
  0x3e   :  { %v308_v43 = vld [vmem:[%s834_s4] sm:$0x1]  ;;  %s439_s4 = sshll.u32 %s720_s26, 4  ;;  %s440_s4 = int_to_ptr.vmem [resolvable:$true] %s439_s4 }
  0x3f   :  { %510 = vmatpush3.bf16.msra.mxu0 %v579_v3  ;;  %530 = vmatpush3.bf16.msra.mxu1 %v587_v8  ;;  %v195_v29 = vpack.i.b16 %v192_v27, %v192_v27  ;;  %v309_v44 = vpack.c.bf16 %v308_v43, %v308_v43  ;;  %v469_v54 = vld [vmem:[%s836_s6] ss:$0 sm:$0xff]  ;;  %s681_s27 = scalar_lea.vmem %s440_s4, 256  ;;  %p686_p7 = scmp.lt.s32.totalorder %s440_s4, %s440_s4 }
  0x40   :  { %511 = vmatprep.subr.bf16.mxu0 %v717_v0  ;;  %531 = vmatprep.subr.bf16.mxu1 %v717_v0  ;;  %p682_p6 = scmp.ne.s32.totalorder %s440_s4, %s681_s27  ;;  %p687_p8 = scmp.lt.s32.totalorder %s681_s27, %s681_s27 }
  0x41   :  { %v200_v33 = vrot.slane %v195_v29, %v199_v30  ;;  %v312_v45 = vpack.i.b16 %v309_v44, %v309_v44 }
  0x42   :  { %p688_p9 = por %p687_p8, %p686_p7 }
  0x43   :  { %512 = vmatpush3.bf16.msra.mxu0 %v580_v5  ;;  %532 = vmatpush3.bf16.msra.mxu1 %v588_v10  ;;  %v317_v48 = vrot.slane %v312_v45, %v199_v30 }
  0x44   :  { %513 = vmatprep.subr.bf16.mxu0 %v717_v0  ;;  %533 = vmatprep.subr.bf16.mxu1 %v717_v0  ;;  %p689_p10 = pnand %p688_p9, %p682_p6 }
  0x47   :  { %514 = vmatpush3.bf16.msra.mxu0 %v581_v7  ;;  %534 = vmatpush3.bf16.msra.mxu1 %v589_v12 }
  0x48   :  { %515 = vmatprep.subr.bf16.mxu0 %v717_v0  ;;  %535 = vmatprep.subr.bf16.mxu1 %v717_v0 }
  0x4b   :  { %516 = vmatpush3.bf16.msra.mxu0 %v582_v9  ;;  %536 = vmatpush3.bf16.msra.mxu1 %v590_v17 }
  0x4c   :  { %517 = vmatprep.subr.bf16.mxu0 %v717_v0  ;;  %537 = vmatprep.subr.bf16.mxu1 %v717_v0 }
  0x4f   :  { %518 = vmatpush3.bf16.msra.mxu0 %v583_v11  ;;  %538 = vmatpush3.bf16.msra.mxu1 %v591_v18 }
  0x50   :  { %519 = vmatprep.subr.bf16.mxu0 %v717_v0  ;;  %539 = vmatprep.subr.bf16.mxu1 %v717_v0 }
  0x53   :  { %520 = vmatpush3.bf16.msra.mxu0 %v584_v13  ;;  %540 = vmatpush3.bf16.msra.mxu1 %v592_v19 }
  0x54   :  { %545 = vmatprep.subr.bf16.mxu0 %v717_v0 }
  0x56   :  { %522 = vmatmul.mubr.bf16.vlgmr.msra.gmra.mxu0 %v85_v16 }
  0x57   :  { %561 = vmatprep.mubr.msk.bf16.mxu0 %vm718_vm0, %v717_v0  ;;  %546 = vmatpush3.bf16.msra.mxu0 %v593_v20 }
  0x58   :  { %547 = vmatprep.subr.bf16.mxu0 %v717_v0 }
  0x5b   :  { %548 = vmatpush3.bf16.msra.mxu0 %v594_v21 }
  0x5c   :  { %549 = vmatprep.subr.bf16.mxu0 %v717_v0 }
  0x5f   :  { %550 = vmatpush3.bf16.msra.mxu0 %v595_v22 }
  0x60   :  { %551 = vmatprep.subr.bf16.mxu0 %v717_v0 }
  0x63   :  { %552 = vmatpush3.bf16.msra.mxu0 %v596_v23 }
  0x64   :  { %553 = vmatprep.subr.bf16.mxu0 %v717_v0 }
  0x67   :  { %554 = vmatpush3.bf16.msra.mxu0 %v597_v24 }
  0x68   :  { %555 = vmatprep.subr.bf16.mxu0 %v717_v0 }
  0x6b   :  { %556 = vmatpush3.bf16.msra.mxu0 %v598_v40 }
  0x6c   :  { %557 = vmatprep.subr.bf16.mxu0 %v717_v0 }
  0x6f   :  { %558 = vmatpush3.bf16.msra.mxu0 %v599_v41 }
  0x70   :  { %559 = vmatprep.subr.bf16.mxu0 %v717_v0 }
  0x73   :  { %560 = vmatpush3.bf16.msra.mxu0 %v600_v42 }
 0x116   :  { %v184_v31 = vpop.f32.mrf.mxu0 }
 0x118   :  { %v523_v32 = vpop.f32.mrf.mxu0 }
 0x11a   :  { %v187_v34 = vpop.f32.mrf.mxu0 }
 0x11b   :  { %v193_v35 = vpack.c.bf16 %v187_v34, %v184_v31 }
 0x11c   :  { %v524_v36 = vpop.f32.mrf.mxu0 }
 0x11d   :  { %v201_v37 = vadd.bf16 %v200_v33, %v193_v35 }
 0x11f   :  { %v202_v39 = vmax.bf16 %v719_v38, %v201_v37 }
 0x121   :  { %542 = vmatmul.mubr.bf16.vlgmr.msra.gmra.mxu1 %v202_v39 }
 0x1e1   :  { %v301_v46 = vpop.f32.mrf.mxu1 }
 0x1e3   :  { %v543_v47 = vpop.f32.mrf.mxu1 }
 0x1e5   :  { %v304_v49 = vpop.f32.mrf.mxu1 }
 0x1e6   :  { %v310_v50 = vpack.c.bf16 %v304_v49, %v301_v46 }
 0x1e7   :  { %v544_v51 = vpop.f32.mrf.mxu1 }
 0x1e8   :  { %v318_v52 = vadd.bf16 %v317_v48, %v310_v50 }
 0x1ea   :  { %v319_v53 = vmax.bf16 %v719_v38, %v318_v52 }
 0x1ec   :  { %562 = vmatmul.mubr.bf16.vlgmr.msra.gmra.mxu0 %v319_v53 }
 0x2ac   :  { %v425_v55 = vpop.f32.mrf.mxu0 }
 0x2ad   :  { %v426_v56 = vadd.f32 %v469_v54, %v425_v55 }
 0x2ae   :  { %v563_v57 = vpop.f32.mrf.mxu0 }
 0x2af   :  { %432 = vst [vmem:[#allocation10] sm:$0xff] %v426_v56 }
 0x2b0   :  { %v428_v58 = vpop.f32.mrf.mxu0 }
 0x2b1   :  { %v429_v59 = vadd.f32 %v469_v54, %v428_v58 }
 0x2b2   :  { %v564_v60 = vpop.f32.mrf.mxu0 }
 0x2b3   :  { %433 = vst [vmem:[#allocation10 + $0x8] sm:$0xff] %v429_v59 }
 0x2b4   :  { %692 = shalt.err (!%p689_p10)
}
 0x2b5   :  { %445 = dma.vmem_to_hbm [thread:$0]  %s440_s4, 256, %s837_s7, [#allocation4], %s713_s11, %s713_s11, %s714_s12  }
 0x2b6   :  { %707 = dma.done.wait [#allocation4], 256  }
 0x2b7   :  { %708 = vsyncadd [#allocation4], 4294967040 }
 0x2b8   :  { %449 = vsyncpa [#allocation3], 1 }
 0x2b9   :  { %450 = vsyncpa [#allocation6], 1 }
 0x2ba   :  { %451 = vsyncpa [#allocation9], 1 }
 0x2bb   :  { %452 = vsyncpa [#allocation4], 1 }

</bundles_post_ra>
